<compile_context>
chip_gen: v7x
topology: tpu7x:2x2x1
jax: 0.10.0
libtpu: 0.0.40
codegen_flags: <defaults>
</compile_context>

<pallas_src>
import functools
import numpy as np

import jax
import jax.numpy as jnp
from jax import lax
from jax.experimental import pallas as pl
from jax.experimental.pallas import tpu as pltpu

LN_EPS = 1e-5
BN_EPS = 1e-5
# TODO(synk): eval-mode BatchNorm2d folded with default running stats
# (mean=0, var=1, gamma=1, beta=0); real checkpoints must feed actual stats.
_BN_SCALE = float(1.0 / np.sqrt(1.0 + BN_EPS))

_NEG = -1e30  # safe "-inf" for masked attention scores

# GEMM tile caps (review: 512^3 step is ~3MB double-buffered, well under VMEM)
_MAX_TM = 512
_MAX_TN = 512
_MAX_TK = 512
_MAX_TM_LN = 1024   # LayerNorm is pure HBM bandwidth -> bigger row tiles
_MAX_KV = 512       # flash-attention KV chunk


def _round_up(x, m):
    return ((x + m - 1) // m) * m


def _pad_tile(dim, max_tile, align):
    """Pick tile size (multiple of `align`, capped) and padded dim it divides."""
    aligned = _round_up(dim, align)
    if aligned <= max_tile:
        return aligned, aligned
    return _round_up(dim, max_tile), max_tile


# ------------------------------------------------------------- GEMM (+bias, +GELU, +residual)

def _matmul_kernel(x_ref, w_ref, b_ref, *rest, activation, n_k, has_residual):
    if has_residual:
        r_ref, o_ref, acc_ref = rest
    else:
        o_ref, acc_ref = rest

    @pl.when(pl.program_id(2) == 0)
    def _():
        acc_ref[...] = jnp.zeros_like(acc_ref)

    acc_ref[...] += jnp.dot(x_ref[...], w_ref[...],
                            preferred_element_type=jnp.float32)

    @pl.when(pl.program_id(2) == n_k - 1)
    def _():
        y = acc_ref[...] + b_ref[...]
        if activation == "gelu":
            # TODO(synk): PyTorch nn.GELU() default is exact erf; tanh approx here.
            c = np.float32(np.sqrt(2.0 / np.pi))
            y = 0.5 * y * (1.0 + jnp.tanh(c * (y + 0.044715 * y * y * y)))
        if has_residual:
            y = y + r_ref[...].astype(jnp.float32)
        o_ref[...] = y.astype(o_ref.dtype)


@functools.partial(jax.jit, static_argnames=("activation", "out_dtype"))
def matmul_bias(x, w, b, activation=None, residual=None, out_dtype=jnp.float32):
    """y = x @ w + b (optional GELU, optional fused residual add)."""
    M, K = x.shape
    N = w.shape[1]
    Mp, tm = _pad_tile(M, _MAX_TM, 16)    # 16-row align for bf16 sublane packing
    Np, tn = _pad_tile(N, _MAX_TN, 128)   # lane-dense output tiles
    Kp, tk = _pad_tile(K, _MAX_TK, 128)
    n_k = Kp // tk

    xp = jnp.pad(x, ((0, Mp - M), (0, Kp - K))).astype(jnp.bfloat16)
    wp = jnp.pad(w, ((0, Kp - K), (0, Np - N))).astype(jnp.bfloat16)
    bp = jnp.pad(b, (0, Np - N)).reshape(1, Np).astype(jnp.float32)

    has_residual = residual is not None
    in_specs = [
        pl.BlockSpec((tm, tk), lambda i, j, k: (i, k)),
        pl.BlockSpec((tk, tn), lambda i, j, k: (k, j)),
        pl.BlockSpec((1, tn), lambda i, j, k: (0, j)),
    ]
    args = [xp, wp, bp]
    if has_residual:
        rp = jnp.pad(residual, ((0, Mp - M), (0, Np - N))).astype(jnp.float32)
        in_specs.append(pl.BlockSpec((tm, tn), lambda i, j, k: (i, j)))
        args.append(rp)

    out = pl.pallas_call(
        functools.partial(_matmul_kernel, activation=activation, n_k=n_k,
                          has_residual=has_residual),
        grid=(Mp // tm, Np // tn, n_k),
        in_specs=in_specs,
        out_specs=pl.BlockSpec((tm, tn), lambda i, j, k: (i, j)),
        out_shape=jax.ShapeDtypeStruct((Mp, Np), out_dtype),
        scratch_shapes=[pltpu.VMEM((tm, tn), jnp.float32)],
        compiler_params=pltpu.CompilerParams(
            dimension_semantics=("parallel", "parallel", "arbitrary")),
    )(*args)
    return out[:M, :N]


# ------------------------------------------------------------------ LayerNorm

def _layernorm_kernel(x_ref, g_ref, b_ref, o_ref, *, eps):
    x = x_ref[...].astype(jnp.float32)
    mu = jnp.mean(x, axis=-1, keepdims=True)
    xc = x - mu
    var = jnp.mean(xc * xc, axis=-1, keepdims=True)
    y = xc * lax.rsqrt(var + eps)
    o_ref[...] = (y * g_ref[...] + b_ref[...]).astype(o_ref.dtype)


@jax.jit
def layernorm(x, gamma, beta):
    M, C = x.shape
    Mp, tm = _pad_tile(M, _MAX_TM_LN, 8)
    xp = jnp.pad(x, ((0, Mp - M), (0, 0)))
    out = pl.pallas_call(
        functools.partial(_layernorm_kernel, eps=LN_EPS),
        grid=(Mp // tm,),
        in_specs=[
            pl.BlockSpec((tm, C), lambda i: (i, 0)),
            pl.BlockSpec((1, C), lambda i: (0, 0)),
            pl.BlockSpec((1, C), lambda i: (0, 0)),
        ],
        out_specs=pl.BlockSpec((tm, C), lambda i: (i, 0)),
        out_shape=jax.ShapeDtypeStruct((Mp, C), x.dtype),
        compiler_params=pltpu.CompilerParams(dimension_semantics=("parallel",)),
    )(xp, gamma.reshape(1, C), beta.reshape(1, C))
    return out[:M]


# ---------------------------------------------------- attention (KV-flash-tiled)

def _attention_kernel(q_ref, k_ref, v_ref, o_ref, m_sc, l_sc, acc_sc,
                      *, scale, n_heads, d, n_kv, kv_tile, n_valid):
    j = pl.program_id(1)

    @pl.when(j == 0)
    def _():
        m_sc[...] = jnp.full(m_sc.shape, _NEG, m_sc.dtype)
        l_sc[...] = jnp.zeros_like(l_sc)
        acc_sc[...] = jnp.zeros_like(acc_sc)

    kv_ids = j * kv_tile + lax.broadcasted_iota(jnp.int32, (1, kv_tile), 1)
    valid = kv_ids < n_valid                                 # mask padded keys

    for h in range(n_heads):
        qh = q_ref[0, :, h * d:(h + 1) * d]
        kh = k_ref[0, :, h * d:(h + 1) * d]
        vh = v_ref[0, :, h * d:(h + 1) * d]
        # scores: contract head dims (no k.T materialization)
        s = lax.dot_general(qh, kh, (((1,), (1,)), ((), ())),
                            preferred_element_type=jnp.float32) * scale
        s = jnp.where(valid, s, _NEG)
        m_prev = m_sc[h]
        m_new = jnp.maximum(m_prev, jnp.max(s, axis=-1, keepdims=True))
        alpha = jnp.exp(m_prev - m_new)
        p = jnp.exp(s - m_new)
        l_sc[h] = alpha * l_sc[h] + jnp.sum(p, axis=-1, keepdims=True)
        # p @ v : contract p's key axis with v's key axis (bugfix)
        acc_sc[h] = alpha * acc_sc[h] + jnp.dot(
            p.astype(vh.dtype), vh, preferred_element_type=jnp.float32)
        m_sc[h] = m_new

    @pl.when(j == n_kv - 1)
    def _():
        outs = [acc_sc[h] * pl.reciprocal(l_sc[h], approx=True)
                for h in range(n_heads)]
        # single lane-dense store of the full (N, heads*d) slab
        o_ref[0] = jnp.concatenate(outs, axis=-1).astype(o_ref.dtype)


@functools.partial(jax.jit, static_argnames=("heads", "dim_head", "scale"))
def attention(q, k, v, heads, dim_head, scale):
    """softmax(q k^T * scale) v.  q/k/v: (B, N, heads*dim_head), head-major."""
    B, N, inner = q.shape
    kv_tile = min(_MAX_KV, _round_up(N, 8))
    Nk = _round_up(N, kv_tile)
    n_kv = Nk // kv_tile

    qf = q.astype(jnp.bfloat16)
    kf = jnp.pad(k, ((0, 0), (0, Nk - N), (0, 0))).astype(jnp.bfloat16)
    vf = jnp.pad(v, ((0, 0), (0, Nk - N), (0, 0))).astype(jnp.bfloat16)

    out = pl.pallas_call(
        functools.partial(_attention_kernel, scale=scale, n_heads=heads,
                          d=dim_head, n_kv=n_kv, kv_tile=kv_tile, n_valid=N),
        grid=(B, n_kv),
        in_specs=[
            pl.BlockSpec((1, N, inner), lambda b, j: (b, 0, 0)),
            pl.BlockSpec((1, kv_tile, inner), lambda b, j: (b, j, 0)),
            pl.BlockSpec((1, kv_tile, inner), lambda b, j: (b, j, 0)),
        ],
        out_specs=pl.BlockSpec((1, N, inner), lambda b, j: (b, 0, 0)),
        out_shape=jax.ShapeDtypeStruct((B, N, inner), jnp.float32),
        scratch_shapes=[pltpu.VMEM((heads, N, 1), jnp.float32),
                        pltpu.VMEM((heads, N, 1), jnp.float32),
                        pltpu.VMEM((heads, N, dim_head), jnp.float32)],
        compiler_params=pltpu.CompilerParams(
            dimension_semantics=("parallel", "arbitrary")),
    )(qf, kf, vf)
    return out


# ------------------------------------------------ fused q/k/v SepConv2d projections

def _qkv_sepconv_kernel(x_ref, dww_ref, dwb_ref, pww_ref, pwb_ref,
                        q_ref, k_ref, v_ref, *, H, W, C):
    # x_ref: (1, H+2, W+2, C) padded input (stride=1, pad=1 depthwise 3x3)
    dww = dww_ref[...].astype(jnp.float32)          # (3, 9, C) hoisted weight load
    accs = [jnp.zeros((H, W, C), jnp.float32) for _ in range(3)]
    for dy in range(3):
        for dx in range(3):
            # ref-indexed tap (offset vector load, no value-slice shuffles)
            tap = x_ref[0, dy:dy + H, dx:dx + W, :].astype(jnp.float32)
            for p in range(3):
                accs[p] = accs[p] + tap * dww[p, dy * 3 + dx][None, None, :]

    outs = (q_ref, k_ref, v_ref)
    for p in range(3):
        a2d = (accs[p].reshape(H * W, C) + dwb_ref[p]) * _BN_SCALE   # eval BN fold
        y = jnp.dot(a2d.astype(jnp.bfloat16), pww_ref[p],
                    preferred_element_type=jnp.float32)
        y = y + pwb_ref[p]
        outs[p][0] = y.astype(outs[p].dtype)


@jax.jit
def sepconv_qkv(x, dw_w, dw_b, pw_w, pw_b):
    """Fused to_q/to_k/to_v SepConv2d: shared input DMA + taps, three dw+pw paths.

    x: (B,H,W,C); dw_w: (3,9,C); dw_b: (3,1,C); pw_w: (3,C,inner) bf16;
    pw_b: (3,1,inner).  Returns (q, k, v) each (B, H*W, inner) bf16, already in
    the packed attention layout.
    """
    B, H, W, C = x.shape
    inner = pw_w.shape[-1]
    xp = jnp.pad(x, ((0, 0), (1, 1), (1, 1), (0, 0)))
    # TODO(synk): tile over H rows with a 2-row halo for large images (56x56 on
    # v5e); a whole image per grid step is fine at these demo sizes.
    q, k, v = pl.pallas_call(
        functools.partial(_qkv_sepconv_kernel, H=H, W=W, C=C),
        grid=(B,),
        in_specs=[
            pl.BlockSpec((1, H + 2, W + 2, C), lambda i: (i, 0, 0, 0)),
            pl.BlockSpec((3, 9, C), lambda i: (0, 0, 0)),
            pl.BlockSpec((3, 1, C), lambda i: (0, 0, 0)),
            pl.BlockSpec((3, C, inner), lambda i: (0, 0, 0)),
            pl.BlockSpec((3, 1, inner), lambda i: (0, 0, 0)),
        ],
        out_specs=(pl.BlockSpec((1, H * W, inner), lambda i: (i, 0, 0)),
                   pl.BlockSpec((1, H * W, inner), lambda i: (i, 0, 0)),
                   pl.BlockSpec((1, H * W, inner), lambda i: (i, 0, 0))),
        out_shape=(jax.ShapeDtypeStruct((B, H * W, inner), jnp.bfloat16),
                   jax.ShapeDtypeStruct((B, H * W, inner), jnp.bfloat16),
                   jax.ShapeDtypeStruct((B, H * W, inner), jnp.bfloat16)),
        compiler_params=pltpu.CompilerParams(dimension_semantics=("parallel",)),
    )(xp, dw_w, dw_b, pw_w, pw_b)
    return q, k, v


# ------------------------------------------------------------------ glue

def im2col(x, k, stride, pad):
    """NHWC patch extraction (glue) feeding the conv-embed GEMM kernel."""
    # TODO(synk): fold im2col into the conv-embed GEMM's K grid axis at 224x224.
    B, H, W, C = x.shape
    xp = jnp.pad(x, ((0, 0), (pad, pad), (pad, pad), (0, 0)))
    Ho = (H + 2 * pad - k) // stride + 1
    Wo = (W + 2 * pad - k) // stride + 1
    cols = []
    for dy in range(k):
        for dx in range(k):
            cols.append(xp[:, dy:dy + stride * (Ho - 1) + 1:stride,
                           dx:dx + stride * (Wo - 1) + 1:stride, :])
    return jnp.concatenate(cols, axis=-1), Ho, Wo


# ------------------------------------------------------------------ params

def _dense(key, fan_in, fan_out, std=0.02):
    kw, kb = jax.random.split(key)
    w = (std * jax.random.normal(kw, (fan_in, fan_out), jnp.float32)).astype(jnp.bfloat16)
    return {"w": w, "b": 0.01 * jax.random.normal(kb, (fan_out,), jnp.float32)}


def _qkv_params(key, c_in, inner):
    k_dw, k_pw, k_pb = jax.random.split(key, 3)
    return {
        "dw_w": 0.02 * jax.random.normal(k_dw, (3, 9, c_in), jnp.float32),
        "dw_b": jnp.zeros((3, 1, c_in), jnp.float32),
        "pw_w": (0.02 * jax.random.normal(k_pw, (3, c_in, inner), jnp.float32)
                 ).astype(jnp.bfloat16),
        "pw_b": 0.01 * jax.random.normal(k_pb, (3, 1, inner), jnp.float32),
    }


def _layer_params(key, dim, heads, dim_head, mlp_dim, project_out):
    inner = heads * dim_head
    keys = jax.random.split(key, 4)
    attn = {
        "ln_g": jnp.ones((dim,), jnp.float32), "ln_b": jnp.zeros((dim,), jnp.float32),
        "qkv": _qkv_params(keys[0], dim, inner),
        "to_out": _dense(keys[1], inner, dim) if project_out else None,
    }
    ff = {
        "ln_g": jnp.ones((dim,), jnp.float32), "ln_b": jnp.zeros((dim,), jnp.float32),
        "fc1": _dense(keys[2], dim, mlp_dim),
        "fc2": _dense(keys[3], mlp_dim, dim),
    }
    return {"attn": attn, "ff": ff}


def init_cvt_params(key, in_channels, dim=64, kernels=(7, 3, 3), strides=(4, 2, 2),
                    heads=(1, 3, 6), depth=(1, 2, 10), scale_dim=4):
    dim_head = dim                      # self.dim in the PyTorch module
    keys = iter(jax.random.split(key, 128))
    params = {"stages": [], "dim_head": dim_head,
              "kernels": kernels, "strides": strides}
    c_in = in_channels
    d = dim
    dims = []
    for s in range(3):
        if s == 1:
            d = (heads[1] // heads[0]) * dim
        elif s == 2:
            d = (heads[2] // heads[1]) * (heads[1] // heads[0]) * dim
        k = kernels[s]
        conv_w = (0.02 * jax.random.normal(next(keys), (k, k, c_in, d), jnp.float32)
                  ).astype(jnp.bfloat16)
        conv = {"w": conv_w,
                "b": 0.01 * jax.random.normal(next(keys), (d,), jnp.float32)}
        ln = {"g": jnp.ones((d,), jnp.float32), "b": jnp.zeros((d,), jnp.float32)}
        project_out = not (heads[s] == 1 and dim_head == d)
        layers = [_layer_params(next(keys), d, heads[s], dim_head, d * scale_dim,
                                project_out)
                  for _ in range(depth[s])]
        params["stages"].append({"conv": conv, "ln": ln, "layers": layers,
                                 "dim": d, "heads": heads[s]})
        c_in = d
        dims.append(d)
    params["cls_token"] = jax.random.normal(next(keys), (1, 1, dims[2]), jnp.float32)
    params["head_ln"] = {"g": jnp.ones((dims[2],), jnp.float32),
                         "b": jnp.zeros((dims[2],), jnp.float32)}
    return params


# ------------------------------------------------------------------ forward

def conv_attention(x, image_size, p, heads, dim_head, last_stage, residual):
    B, N, C = x.shape
    inner = heads * dim_head
    scale = float(dim_head) ** -0.5
    if last_stage:
        cls_tok = x[:, :1, :].astype(jnp.bfloat16)   # cls bypasses the conv proj
        x_sp = x[:, 1:, :]
    else:
        x_sp = x
    H = W = image_size
    xs = x_sp.reshape(B, H, W, C)

    qkv = p["qkv"]
    q, k, v = sepconv_qkv(xs, qkv["dw_w"], qkv["dw_b"], qkv["pw_w"], qkv["pw_b"])
    if last_stage:
        q = jnp.concatenate([cls_tok, q], axis=1)
        k = jnp.concatenate([cls_tok, k], axis=1)
        v = jnp.concatenate([cls_tok, v], axis=1)

    out = attention(q, k, v, heads, dim_head, scale)            # (B, n, inner) f32
    n = out.shape[1]
    if p["to_out"] is not None:
        # residual add fused into the GEMM epilogue
        out = matmul_bias(out.reshape(B * n, inner),
                          p["to_out"]["w"], p["to_out"]["b"],
                          residual=residual.reshape(B * n, C)).reshape(B, n, C)
    else:
        out = out.astype(residual.dtype) + residual
    return out


def transformer(x, image_size, layers, heads, dim_head, last_stage):
    B, N, C = x.shape
    for lp in layers:
        xn = layernorm(x.reshape(B * N, C),
                       lp["attn"]["ln_g"], lp["attn"]["ln_b"]).reshape(B, N, C)
        x = conv_attention(xn, image_size, lp["attn"], heads, dim_head,
                           last_stage, residual=x)
        xn = layernorm(x.reshape(B * N, C), lp["ff"]["ln_g"], lp["ff"]["ln_b"])
        h = matmul_bias(xn, lp["ff"]["fc1"]["w"], lp["ff"]["fc1"]["b"],
                        activation="gelu", out_dtype=jnp.bfloat16)
        x = matmul_bias(h, lp["ff"]["fc2"]["w"], lp["ff"]["fc2"]["b"],
                        residual=x.reshape(B * N, C)).reshape(B, N, C)
    return x


def cvt_forward(params, img_nchw):
    x = jnp.transpose(img_nchw, (0, 2, 3, 1))        # NCHW -> NHWC
    B = x.shape[0]
    dim_head = params["dim_head"]
    t = None
    for s, sp in enumerate(params["stages"]):
        k = params["kernels"][s]
        stride = params["strides"][s]
        pad = 2 if s == 0 else 1
        patches, Ho, Wo = im2col(x, k, stride, pad)
        dim = sp["dim"]
        t = matmul_bias(patches.reshape(B * Ho * Wo, -1),
                        sp["conv"]["w"].reshape(-1, dim), sp["conv"]["b"])
        t = layernorm(t, sp["ln"]["g"], sp["ln"]["b"]).reshape(B, Ho * Wo, dim)
        last_stage = (s == 2)
        if last_stage:
            cls = jnp.broadcast_to(params["cls_token"], (B, 1, dim))
            t = jnp.concatenate([cls, t], axis=1)
        t = transformer(t, Ho, sp["layers"], sp["heads"], dim_head, last_stage)
        if not last_stage:
            x = t.reshape(B, Ho, Wo, dim)            # tokens -> NHWC for next stage
    out = t[:, 0, :]                                  # pool == 'cls'
    out = layernorm(out, params["head_ln"]["g"], params["head_ln"]["b"])
    return out


if __name__ == "__main__":
    key = jax.random.PRNGKey(0)
    k_img, k_par = jax.random.split(key)

    # Small but structurally consistent shapes: 32x32 image -> 8x8 / 4x4 / 2x2 stages.
    img = jax.random.normal(k_img, (2, 3, 32, 32), jnp.float32)   # NCHW like PyTorch

    # depth reduced from the (1, 2, 10) default to keep the demo small.
    # Dropout probs are 0 in the reference -> identity.
    params = init_cvt_params(k_par, in_channels=3, dim=64,
                             kernels=(7, 3, 3), strides=(4, 2, 2),
                             heads=(1, 3, 6), depth=(1, 2, 2), scale_dim=4)

    out = cvt_forward(params, img)
    out = jax.block_until_ready(out)
    assert out.shape == (2, 384), out.shape
    assert bool(jnp.all(jnp.isfinite(out)))
    print("KERNEL_OK")
</pallas_src>

<mosaic_0001>
module attributes {stable_mosaic.version = 11 : i64} {
  func.func @_matmul_kernel(%arg0: i32, %arg1: i32, %arg2: i32, %arg3: memref<128x256xbf16, #tpu.memory_space<vmem>>, %arg4: memref<256x128xbf16, #tpu.memory_space<vmem>>, %arg5: memref<1x128xf32, #tpu.memory_space<vmem>>, %arg6: memref<128x128xf32, #tpu.memory_space<vmem>>, %arg7: memref<128x128xf32, #tpu.memory_space<vmem>>) attributes {dimension_semantics = [#tpu.dimension_semantics<parallel>, #tpu.dimension_semantics<parallel>, #tpu.dimension_semantics<arbitrary>], iteration_bounds = array<i64: 1, 1, 1>, scalar_prefetch = 0 : i64, scratch_operands = 1 : i64, tpu.core_type = #tpu.core_type<tc>, window_params = [{transform_indices = @transform_0, window_bounds = array<i64: 128, 256>}, {transform_indices = @transform_1, window_bounds = array<i64: 256, 128>}, {transform_indices = @transform_2, window_bounds = array<i64: 1, 128>}, {transform_indices = @transform_3, window_bounds = array<i64: 128, 128>}]} {
    %c0_i32 = arith.constant 0 : i32
    %0 = arith.cmpi eq, %arg2, %c0_i32 : i32
    %1 = arith.extui %0 : i1 to i32
    %c0_i32_0 = arith.constant 0 : i32
    %2 = arith.cmpi ne, %1, %c0_i32_0 : i32
    scf.if %2 {
      %cst_10 = arith.constant 0.000000e+00 : f32
      %12 = vector.broadcast %cst_10 : f32 to vector<128x128xf32>
      %c0_11 = arith.constant 0 : index
      %c0_12 = arith.constant 0 : index
      %13 = vector.load %arg7[%c0_11, %c0_12] : memref<128x128xf32, #tpu.memory_space<vmem>>, vector<128x128xf32>
      tpu.vector_store %arg7[%c0_11, %c0_12], %12 {strides = array<i32>} : memref<128x128xf32, #tpu.memory_space<vmem>>, vector<128x128xf32>,
    } else {
    }
    %c0 = arith.constant 0 : index
    %c0_1 = arith.constant 0 : index
    %3 = vector.load %arg7[%c0, %c0_1] : memref<128x128xf32, #tpu.memory_space<vmem>>, vector<128x128xf32>
    %c0_2 = arith.constant 0 : index
    %c0_3 = arith.constant 0 : index
    %4 = vector.load %arg3[%c0_2, %c0_3] : memref<128x256xbf16, #tpu.memory_space<vmem>>, vector<128x256xbf16>
    %c0_4 = arith.constant 0 : index
    %c0_5 = arith.constant 0 : index
    %5 = vector.load %arg4[%c0_4, %c0_5] : memref<256x128xbf16, #tpu.memory_space<vmem>>, vector<256x128xbf16>
    %cst = arith.constant dense<0.000000e+00> : vector<128x128xf32>
    %6 = tpu.matmul %4, %5, %cst {dimension_numbers = #tpu.dot_dimension_numbers<[1], [0], [0], [1], [0, 0, 1, 1], [], []>} : vector<128x256xbf16>, vector<256x128xbf16>, vector<128x128xf32> -> vector<128x128xf32>
    %7 = arith.addf %3, %6 : vector<128x128xf32>
    %c0_6 = arith.constant 0 : index
    %c0_7 = arith.constant 0 : index
    %8 = vector.load %arg7[%c0_6, %c0_7] : memref<128x128xf32, #tpu.memory_space<vmem>>, vector<128x128xf32>
    tpu.vector_store %arg7[%c0_6, %c0_7], %7 {strides = array<i32>} : memref<128x128xf32, #tpu.memory_space<vmem>>, vector<128x128xf32>,
    %c0_i32_8 = arith.constant 0 : i32
    %9 = arith.cmpi eq, %arg2, %c0_i32_8 : i32
    %10 = arith.extui %9 : i1 to i32
    %c0_i32_9 = arith.constant 0 : i32
    %11 = arith.cmpi ne, %10, %c0_i32_9 : i32
    scf.if %11 {
      %c0_10 = arith.constant 0 : index
      %c0_11 = arith.constant 0 : index
      %12 = vector.load %arg7[%c0_10, %c0_11] : memref<128x128xf32, #tpu.memory_space<vmem>>, vector<128x128xf32>
      %c0_12 = arith.constant 0 : index
      %c0_13 = arith.constant 0 : index
      %13 = vector.load %arg5[%c0_12, %c0_13] : memref<1x128xf32, #tpu.memory_space<vmem>>, vector<1x128xf32>
      %14 = vector.broadcast %13 : vector<1x128xf32> to vector<128x128xf32>
      %15 = arith.addf %12, %14 : vector<128x128xf32>
      %c0_14 = arith.constant 0 : index
      %c0_15 = arith.constant 0 : index
      %16 = vector.load %arg6[%c0_14, %c0_15] : memref<128x128xf32, #tpu.memory_space<vmem>>, vector<128x128xf32>
      tpu.vector_store %arg6[%c0_14, %c0_15], %15 {strides = array<i32>} : memref<128x128xf32, #tpu.memory_space<vmem>>, vector<128x128xf32>,
    } else {
    }
    return
  }
  func.func @transform_0(%arg0: i32, %arg1: i32, %arg2: i32) -> (i32, i32) {
    %c0_i32 = arith.constant 0 : i32
    return %arg0, %arg2 : i32, i32
  }
  func.func @transform_1(%arg0: i32, %arg1: i32, %arg2: i32) -> (i32, i32) {
    %c0_i32 = arith.constant 0 : i32
    return %arg2, %arg1 : i32, i32
  }
  func.func @transform_2(%arg0: i32, %arg1: i32, %arg2: i32) -> (i32, i32) {
    %c0_i32 = arith.constant 0 : i32
    %c0_i32_0 = arith.constant 0 : i32
    return %c0_i32, %arg1 : i32, i32
  }
  func.func @transform_3(%arg0: i32, %arg1: i32, %arg2: i32) -> (i32, i32) {
    %c0_i32 = arith.constant 0 : i32
    return %arg0, %arg1 : i32, i32
  }
}

</mosaic_0001>

<bundles_post_ra>
// kernel: matmul_bias.1
= control target key start
LH: loop header
LB: loop body
LE: loop exit
PB: predicated region body
PF: predicated region fallthrough
CT: control target
= control target key end

     0   :  { %s804_s1 = inlined_call_operand.vmem [shape: bf16[256,128], index: 1, kind: input, shape index: {}]   ;;  %s805_s0 = inlined_call_operand.vmem [shape: bf16[128,256], index: 0, kind: input, shape index: {}]   ;;  %s806_s2 = inlined_call_operand.vmem [shape: f32[1,128], index: 2, kind: input, shape index: {}]   ;;  %s807_s3 = inlined_call_operand.vmem [shape: f32[128,128], index: 3, kind: output, shape index: {}]  }
   0x1   :  { %v579_v0 = vld [vmem:[%s804_s1 + $0x40] sm:$0xff]   ;;  %v581_v2 = vld [vmem:[%s804_s1 + $0x48] sm:$0xff]   ;;  %v583_v4 = vld [vmem:[%s804_s1 + $0x50] sm:$0xff]  }
   0x2   :  { %v580_v1 = vld [vmem:[%s804_s1] sm:$0xff]   ;;  %499 = vmatprep.subr.bf16.mxu0 %v579_v0  ;;  %563 = vmatprep.subr.bf16.mxu1 %v579_v0  ;;  %v582_v3 = vld [vmem:[%s804_s1 + $0x8] sm:$0xff]   ;;  %v584_v5 = vld [vmem:[%s804_s1 + $0x10] sm:$0xff]  }
   0x3   :  { %500 = vmatpush3.bf16.msra.mxu0 %v580_v1  ;;  %571 = vmatpush3.bf16.msra.mxu1 %v580_v1  ;;  %v585_v6 = vld [vmem:[%s804_s1 + $0x58] sm:$0xff]   ;;  %v587_v8 = vld [vmem:[%s804_s1 + $0x60] sm:$0xff]   ;;  %v589_v10 = vld [vmem:[%s804_s1 + $0x68] sm:$0xff]  }
   0x4   :  { %501 = vmatprep.subr.bf16.mxu0 %v581_v2  ;;  %564 = vmatprep.subr.bf16.mxu1 %v581_v2  ;;  %v586_v7 = vld [vmem:[%s804_s1 + $0x18] sm:$0xff]   ;;  %v588_v9 = vld [vmem:[%s804_s1 + $0x20] sm:$0xff]   ;;  %v590_v13 = vld [vmem:[%s804_s1 + $0x28] sm:$0xff]  }
   0x5   :  { %v597_v11 = vld [vmem:[%s805_s0 + $0x4] ss:$8 sps:$4 sm:$0xff]   ;;  %v591_v14 = vld [vmem:[%s804_s1 + $0x70] sm:$0xff]   ;;  %v593_v16 = vld [vmem:[%s804_s1 + $0x78] sm:$0xff]  }
   0x6   :  { %v600_v12 = vld [vmem:[%s805_s0 + $0x44] ss:$8 sps:$4 sm:$0xff]   ;;  %307 = vmatprep.mubr.bf16.mxu0 %v597_v11  ;;  %v592_v15 = vld [vmem:[%s804_s1 + $0x30] sm:$0xff]   ;;  %v594_v17 = vld [vmem:[%s804_s1 + $0x38] sm:$0xff]  }
   0x7   :  { %502 = vmatpush3.bf16.msra.mxu0 %v582_v3  ;;  %572 = vmatpush3.bf16.msra.mxu1 %v582_v3  ;;  %v595_v18 = vld [vmem:[%s805_s0] ss:$8 sps:$4 sm:$0xff]   ;;  %v601_v20 = vld [vmem:[%s805_s0 + $0x14] ss:$8 sps:$4 sm:$0xff]   ;;  %v605_v22 = vld [vmem:[%s805_s0 + $0x10] ss:$8 sps:$4 sm:$0xff]  }
   0x8   :  { %503 = vmatprep.subr.bf16.mxu0 %v583_v4  ;;  %565 = vmatprep.subr.bf16.mxu1 %v583_v4  ;;  %v598_v19 = vld [vmem:[%s805_s0 + $0x40] ss:$8 sps:$4 sm:$0xff]   ;;  %v603_v21 = vld [vmem:[%s805_s0 + $0x54] ss:$8 sps:$4 sm:$0xff]   ;;  %v606_v23 = vld [vmem:[%s805_s0 + $0x50] ss:$8 sps:$4 sm:$0xff]  }
   0x9   :  { %339 = vmatprep.mubr.bf16.mxu1 %v600_v12  ;;  %v607_v24 = vld [vmem:[%s805_s0 + $0x24] ss:$8 sps:$4 sm:$0xff]   ;;  %v611_v26 = vld [vmem:[%s805_s0 + $0x20] ss:$8 sps:$4 sm:$0xff]   ;;  %v613_v28 = vld [vmem:[%s805_s0 + $0x34] ss:$8 sps:$4 sm:$0xff]  }
   0xa   :  { %v609_v25 = vld [vmem:[%s805_s0 + $0x64] ss:$8 sps:$4 sm:$0xff]   ;;  %v612_v27 = vld [vmem:[%s805_s0 + $0x60] ss:$8 sps:$4 sm:$0xff]   ;;  %v615_v29 = vld [vmem:[%s805_s0 + $0x74] ss:$8 sps:$4 sm:$0xff]  }
   0xb   :  { %504 = vmatpush3.bf16.msra.mxu0 %v584_v5  ;;  %573 = vmatpush3.bf16.msra.mxu1 %v584_v5  ;;  %v617_v30 = vld [vmem:[%s805_s0 + $0x30] ss:$8 sps:$4 sm:$0xff]   ;;  %v738_v35 = vld [vmem:[%s806_s2] ss:$0 sm:$0xff] }
   0xc   :  { %505 = vmatprep.subr.bf16.mxu0 %v585_v6  ;;  %566 = vmatprep.subr.bf16.mxu1 %v585_v6  ;;  %v618_v31 = vld [vmem:[%s805_s0 + $0x70] ss:$8 sps:$4 sm:$0xff]  }
   0xf   :  { %506 = vmatpush3.bf16.msra.mxu0 %v586_v7  ;;  %574 = vmatpush3.bf16.msra.mxu1 %v586_v7 }
  0x10   :  { %507 = vmatprep.subr.bf16.mxu0 %v587_v8  ;;  %567 = vmatprep.subr.bf16.mxu1 %v587_v8 }
  0x13   :  { %508 = vmatpush3.bf16.msra.mxu0 %v588_v9  ;;  %575 = vmatpush3.bf16.msra.mxu1 %v588_v9 }
  0x14   :  { %509 = vmatprep.subr.bf16.mxu0 %v589_v10  ;;  %568 = vmatprep.subr.bf16.mxu1 %v589_v10 }
  0x17   :  { %510 = vmatpush3.bf16.msra.mxu0 %v590_v13  ;;  %576 = vmatpush3.bf16.msra.mxu1 %v590_v13 }
  0x18   :  { %511 = vmatprep.subr.bf16.mxu0 %v591_v14  ;;  %569 = vmatprep.subr.bf16.mxu1 %v591_v14 }
  0x1b   :  { %512 = vmatpush3.bf16.msra.mxu0 %v592_v15  ;;  %577 = vmatpush3.bf16.msra.mxu1 %v592_v15 }
  0x1c   :  { %513 = vmatprep.subr.bf16.mxu0 %v593_v16  ;;  %570 = vmatprep.subr.bf16.mxu1 %v593_v16 }
  0x1f   :  { %514 = vmatpush3.bf16.msra.mxu0 %v594_v17  ;;  %578 = vmatpush3.bf16.msra.mxu1 %v594_v17 }
  0x22   :  { %308 = vmatmul.mubr.bf16.vlgmr.msra.gmra.mrb[0].mxu0 %v595_v18  ;;  %340 = vmatmul.mubr.bf16.vlgmr.msra.gmra.mrb[0].mxu1 %v598_v19 }
  0x23   :  { %315 = vmatprep.mubr.bf16.mxu0 %v601_v20  ;;  %347 = vmatprep.mubr.bf16.mxu1 %v603_v21 }
  0x2a   :  { %316 = vmatmul.mubr.bf16.gmra.mrb[4].mxu0 %v605_v22  ;;  %348 = vmatmul.mubr.bf16.gmra.mrb[4].mxu1 %v606_v23 }
  0x2b   :  { %323 = vmatprep.mubr.bf16.mxu0 %v607_v24  ;;  %355 = vmatprep.mubr.bf16.mxu1 %v609_v25 }
  0x32   :  { %324 = vmatmul.mubr.bf16.gmra.mrb[8].mxu0 %v611_v26  ;;  %356 = vmatmul.mubr.bf16.gmra.mrb[8].mxu1 %v612_v27 }
  0x33   :  { %331 = vmatprep.mubr.bf16.mxu0 %v613_v28  ;;  %363 = vmatprep.mubr.bf16.mxu1 %v615_v29 }
  0x3a   :  { %332 = vmatmul.mubr.bf16.gmra.mrb[12].mxu0 %v617_v30  ;;  %364 = vmatmul.mubr.bf16.gmra.mrb[12].mxu1 %v618_v31 }
  0xf5   :  { %v515_v32 = vpop.f32.mrb[0].mxu0  ;;  %v539_v33 = vpop.f32.mrb[0].mxu1 }
  0xf6   :  { %v516_v34 = vpop.f32.mrb[1].mxu0  ;;  %v540_v36 = vpop.f32.mrb[1].mxu1 }
  0xf7   :  { %v517_v37 = vadd.f32 %v516_v34, %v515_v32  ;;  %v541_v38 = vadd.f32 %v540_v36, %v539_v33  ;;  %v518_v39 = vpop.f32.mrb[2].mxu0  ;;  %v542_v40 = vpop.f32.mrb[2].mxu1 }
  0xf8   :  { %v519_v41 = vpop.f32.mrb[3].mxu0  ;;  %v543_v42 = vpop.f32.mrb[3].mxu1 }
  0xf9   :  { %v430_v43 = vadd.f32 %v517_v37, %v738_v35  ;;  %v438_v44 = vadd.f32 %v541_v38, %v738_v35  ;;  %v520_v45 = vadd.f32 %v519_v41, %v518_v39  ;;  %v544_v46 = vadd.f32 %v543_v42, %v542_v40 }
  0xfb   :  { %446 = vst [vmem:[%s807_s3] sm:$0xff] %v430_v43  ;;  %454 = vst [vmem:[%s807_s3 + $0x40] sm:$0xff] %v438_v44  ;;  %v431_v47 = vadd.f32 %v520_v45, %v738_v35  ;;  %v439_v48 = vadd.f32 %v544_v46, %v738_v35 }
  0xfd   :  { %447 = vst [vmem:[%s807_s3 + $0x8] sm:$0xff] %v431_v47  ;;  %455 = vst [vmem:[%s807_s3 + $0x48] sm:$0xff] %v439_v48  ;;  %v521_v49 = vpop.f32.mrb[4].mxu0  ;;  %v545_v50 = vpop.f32.mrb[4].mxu1 }
  0xfe   :  { %v522_v51 = vpop.f32.mrb[5].mxu0  ;;  %v546_v52 = vpop.f32.mrb[5].mxu1 }
  0xff   :  { %v523_v53 = vadd.f32 %v522_v51, %v521_v49  ;;  %v547_v54 = vadd.f32 %v546_v52, %v545_v50  ;;  %v524_v55 = vpop.f32.mrb[6].mxu0  ;;  %v548_v56 = vpop.f32.mrb[6].mxu1 }
 0x100   :  { %v525_v57 = vpop.f32.mrb[7].mxu0  ;;  %v549_v58 = vpop.f32.mrb[7].mxu1 }
 0x101   :  { %v432_v59 = vadd.f32 %v523_v53, %v738_v35  ;;  %v440_v60 = vadd.f32 %v547_v54, %v738_v35  ;;  %v526_v61 = vadd.f32 %v525_v57, %v524_v55  ;;  %v550_v62 = vadd.f32 %v549_v58, %v548_v56 }
 0x103   :  { %448 = vst [vmem:[%s807_s3 + $0x10] sm:$0xff] %v432_v59  ;;  %456 = vst [vmem:[%s807_s3 + $0x50] sm:$0xff] %v440_v60  ;;  %v433_v63 = vadd.f32 %v526_v61, %v738_v35  ;;  %v441_v0 = vadd.f32 %v550_v62, %v738_v35 }
 0x105   :  { %449 = vst [vmem:[%s807_s3 + $0x18] sm:$0xff] %v433_v63  ;;  %457 = vst [vmem:[%s807_s3 + $0x58] sm:$0xff] %v441_v0  ;;  %v527_v1 = vpop.f32.mrb[8].mxu0  ;;  %v551_v2 = vpop.f32.mrb[8].mxu1 }
 0x106   :  { %v528_v3 = vpop.f32.mrb[9].mxu0  ;;  %v552_v4 = vpop.f32.mrb[9].mxu1 }
 0x107   :  { %v529_v5 = vadd.f32 %v528_v3, %v527_v1  ;;  %v553_v6 = vadd.f32 %v552_v4, %v551_v2  ;;  %v530_v7 = vpop.f32.mrb[10].mxu0  ;;  %v554_v8 = vpop.f32.mrb[10].mxu1 }
 0x108   :  { %v531_v9 = vpop.f32.mrb[11].mxu0  ;;  %v555_v10 = vpop.f32.mrb[11].mxu1 }
 0x109   :  { %v434_v11 = vadd.f32 %v529_v5, %v738_v35  ;;  %v442_v12 = vadd.f32 %v553_v6, %v738_v35  ;;  %v532_v13 = vadd.f32 %v531_v9, %v530_v7  ;;  %v556_v14 = vadd.f32 %v555_v10, %v554_v8 }
 0x10b   :  { %450 = vst [vmem:[%s807_s3 + $0x20] sm:$0xff] %v434_v11  ;;  %458 = vst [vmem:[%s807_s3 + $0x60] sm:$0xff] %v442_v12  ;;  %v435_v15 = vadd.f32 %v532_v13, %v738_v35  ;;  %v443_v16 = vadd.f32 %v556_v14, %v738_v35 }
 0x10d   :  { %451 = vst [vmem:[%s807_s3 + $0x28] sm:$0xff] %v435_v15  ;;  %459 = vst [vmem:[%s807_s3 + $0x68] sm:$0xff] %v443_v16  ;;  %v533_v17 = vpop.f32.mrb[12].mxu0  ;;  %v557_v18 = vpop.f32.mrb[12].mxu1 }
 0x10e   :  { %v534_v19 = vpop.f32.mrb[13].mxu0  ;;  %v558_v20 = vpop.f32.mrb[13].mxu1 }
 0x10f   :  { %v535_v21 = vadd.f32 %v534_v19, %v533_v17  ;;  %v559_v22 = vadd.f32 %v558_v20, %v557_v18  ;;  %v536_v23 = vpop.f32.mrb[14].mxu0  ;;  %v560_v24 = vpop.f32.mrb[14].mxu1 }
 0x110   :  { %v537_v25 = vpop.f32.mrb[15].mxu0  ;;  %v561_v26 = vpop.f32.mrb[15].mxu1 }
 0x111   :  { %v436_v27 = vadd.f32 %v535_v21, %v738_v35  ;;  %v444_v28 = vadd.f32 %v559_v22, %v738_v35  ;;  %v538_v29 = vadd.f32 %v537_v25, %v536_v23  ;;  %v562_v30 = vadd.f32 %v561_v26, %v560_v24 }
 0x113   :  { %452 = vst [vmem:[%s807_s3 + $0x30] sm:$0xff] %v436_v27  ;;  %460 = vst [vmem:[%s807_s3 + $0x70] sm:$0xff] %v444_v28  ;;  %v437_v31 = vadd.f32 %v538_v29, %v738_v35  ;;  %v445_v32 = vadd.f32 %v562_v30, %v738_v35 }
 0x115   :  { %453 = vst [vmem:[%s807_s3 + $0x38] sm:$0xff] %v437_v31  ;;  %461 = vst [vmem:[%s807_s3 + $0x78] sm:$0xff] %v445_v32 }

</bundles_post_ra>
